<compile_context>
chip_gen: v5e
topology: v5e:2x2
jax: 0.10.0
libtpu: 0.0.40
codegen_flags: <defaults>
</compile_context>

<pallas_src>
import jax
import jax.numpy as jnp
from jax.experimental import pallas as pl
from jax.experimental.pallas import tpu as pltpu


def _round_up(a, b):
    return ((a + b - 1) // b) * b


def _embedding_kernel(x_ref, w1_ref, b1_ref, w2_ref, b2_ref, o_ref):
    # x_ref : [tile_n, s]   (natural row-major input tile)
    # w1_ref: [hidden, s]   b1_ref: [hidden, 1]
    # w2_ref: [g, hidden]   b2_ref: [g, 1]
    # o_ref : [g, tile_n]   (lane-dense output slab)
    xt = x_ref[...].T  # XLU transpose; kernel is DMA-bound so this is hidden
    h = jnp.dot(w1_ref[...], xt, preferred_element_type=jnp.float32)
    h = jnp.maximum(h + b1_ref[...], 0.0)          # bias broadcasts over lanes
    o = jnp.dot(w2_ref[...], h, preferred_element_type=jnp.float32)
    o_ref[...] = (o + b2_ref[...]).astype(o_ref.dtype)


def embedding_forward_lane_dense(x, w1, b1, w2, b2, *, tile_n=16384):
    """Lane-dense core: x [N, s] -> [g, N]."""
    n, s = x.shape
    hidden = w1.shape[0]
    g = w2.shape[0]

    # Large lane tiles amortize per-grid-step overhead; keep the grid >= 2
    # (and even when cheap) so the "parallel" axis splits evenly across the
    # two TensorCores on v7x.
    num_tiles = pl.cdiv(n, tile_n)
    if num_tiles < 2:
        num_tiles = 2 if n > 128 else 1
    elif num_tiles % 2:
        num_tiles += 1
    tile = min(tile_n, max(128, _round_up(pl.cdiv(n, num_tiles), 128)))
    grid = (pl.cdiv(n, tile),)

    b1c = b1.reshape(hidden, 1).astype(jnp.float32)
    b2c = b2.reshape(g, 1).astype(jnp.float32)

    itemsize = jnp.dtype(x.dtype).itemsize
    cost = pl.CostEstimate(
        flops=2 * n * (s * hidden + hidden * g),
        transcendentals=0,
        bytes_accessed=(s + g) * n * itemsize
        + (w1.size + w2.size + hidden + g) * 4,
    )

    return pl.pallas_call(
        _embedding_kernel,
        out_shape=jax.ShapeDtypeStruct((g, n), x.dtype),
        grid_spec=pltpu.PrefetchScalarGridSpec(
            num_scalar_prefetch=0,
            grid=grid,
            in_specs=[
                pl.BlockSpec((tile, s), lambda i: (i, 0)),        # x (natural layout)
                pl.BlockSpec((hidden, s), lambda i: (0, 0)),      # W1 (resident)
                pl.BlockSpec((hidden, 1), lambda i: (0, 0)),      # b1
                pl.BlockSpec((g, hidden), lambda i: (0, 0)),      # W2 (resident)
                pl.BlockSpec((g, 1), lambda i: (0, 0)),           # b2
            ],
            out_specs=pl.BlockSpec((g, tile), lambda i: (0, i)),  # lane-dense output
        ),
        compiler_params=pltpu.CompilerParams(
            dimension_semantics=("parallel",)),
        cost_estimate=cost,
    )(x, w1, b1c, w2, b2c)


def embedding_forward(x, w1, b1, w2, b2, *, tile_n=16384):
    """x: [N, s]; w1: [hidden, s]; b1: [hidden]; w2: [g, hidden]; b2: [g].

    Returns [N, g], matching the PyTorch module's forward.  Consumers that can
    accept the lane-dense [g, N] slab should call
    `embedding_forward_lane_dense` directly and skip the final transpose pass.
    """
    out_t = embedding_forward_lane_dense(x, w1, b1, w2, b2, tile_n=tile_n)
    return out_t.T


def xavier_normal(key, shape):
    # PyTorch nn.init.xavier_normal_ for a Linear weight [out, in].
    fan_out, fan_in = shape
    std = (2.0 / (fan_in + fan_out)) ** 0.5
    return std * jax.random.normal(key, shape, dtype=jnp.float32)


if __name__ == "__main__":
    # Module hyper-params (small, consistent with the forward signature).
    s, hidden_size, g = 16, 32, 8
    n_particles = 300  # deliberately NOT a multiple of 128 (exercises ragged block)

    key = jax.random.PRNGKey(0)
    kx, kw1, kw2 = jax.random.split(key, 3)

    # Deterministic parameter init matching the module's __init__ (SN=False).
    # TODO(synk): the SN=True (SpectralNorm) constructor branch is not implemented.
    w1 = xavier_normal(kw1, (hidden_size, s))   # Linear(s, hidden): weight [hidden, s]
    b1 = jnp.zeros((hidden_size,), jnp.float32)
    w2 = xavier_normal(kw2, (g, hidden_size))   # Linear(hidden, g): weight [g, hidden]
    b2 = jnp.zeros((g,), jnp.float32)

    x = jax.random.normal(kx, (n_particles, s), dtype=jnp.float32)

    out = embedding_forward(x, w1, b1, w2, b2)
    jax.block_until_ready(out)

    # Reference check in plain JAX (same math as the PyTorch module).
    # Tolerance sized for default TPU matmul precision (f32 operands may be
    # truncated to bf16 on the MXU); real indexing/layout bugs give O(1) errors.
    ref = jnp.maximum(x @ w1.T + b1[None, :], 0.0) @ w2.T + b2[None, :]
    assert out.shape == (n_particles, g)
    max_err = float(jnp.max(jnp.abs(out - ref)))
    assert jnp.allclose(out, ref, atol=2e-2, rtol=2e-2), max_err

    print("KERNEL_OK")
</pallas_src>

<mosaic_0001>
module attributes {stable_mosaic.version = 11 : i64} {
  func.func @_embedding_kernel(%arg0: i32, %arg1: memref<256x16xf32, #tpu.memory_space<vmem>>, %arg2: memref<32x16xf32, #tpu.memory_space<vmem>>, %arg3: memref<32x1xf32, #tpu.memory_space<vmem>>, %arg4: memref<8x32xf32, #tpu.memory_space<vmem>>, %arg5: memref<8x1xf32, #tpu.memory_space<vmem>>, %arg6: memref<8x256xf32, #tpu.memory_space<vmem>>) attributes {dimension_semantics = [#tpu.dimension_semantics<parallel>], iteration_bounds = array<i64: 2>, scalar_prefetch = 0 : i64, scratch_operands = 0 : i64, tpu.core_type = #tpu.core_type<tc>, window_params = [{transform_indices = @transform_0, window_bounds = array<i64: 256, 16>}, {pipeline_mode = #tpu.pipeline_mode<synchronous>, transform_indices = @transform_1, window_bounds = array<i64: 32, 16>}, {pipeline_mode = #tpu.pipeline_mode<synchronous>, transform_indices = @transform_2, window_bounds = array<i64: 32, 1>}, {pipeline_mode = #tpu.pipeline_mode<synchronous>, transform_indices = @transform_3, window_bounds = array<i64: 8, 32>}, {pipeline_mode = #tpu.pipeline_mode<synchronous>, transform_indices = @transform_4, window_bounds = array<i64: 8, 1>}, {transform_indices = @transform_5, window_bounds = array<i64: 8, 256>}]} {
    %c0 = arith.constant 0 : index
    %c0_0 = arith.constant 0 : index
    %0 = vector.load %arg1[%c0, %c0_0] : memref<256x16xf32, #tpu.memory_space<vmem>>, vector<256x16xf32>
    %1 = tpu.transpose %0, [1, 0] : vector<256x16xf32> -> vector<16x256xf32>
    %c0_1 = arith.constant 0 : index
    %c0_2 = arith.constant 0 : index
    %2 = vector.load %arg2[%c0_1, %c0_2] : memref<32x16xf32, #tpu.memory_space<vmem>>, vector<32x16xf32>
    %cst = arith.constant dense<0.000000e+00> : vector<32x256xf32>
    %3 = tpu.matmul %2, %1, %cst {dimension_numbers = #tpu.dot_dimension_numbers<[1], [0], [0], [1], [0, 0, 1, 1], [], []>} : vector<32x16xf32>, vector<16x256xf32>, vector<32x256xf32> -> vector<32x256xf32>
    %c0_3 = arith.constant 0 : index
    %c0_4 = arith.constant 0 : index
    %4 = vector.load %arg3[%c0_3, %c0_4] : memref<32x1xf32, #tpu.memory_space<vmem>>, vector<32x1xf32>
    %5 = vector.broadcast %4 : vector<32x1xf32> to vector<32x256xf32>
    %6 = arith.addf %3, %5 : vector<32x256xf32>
    %cst_5 = arith.constant 0.000000e+00 : f32
    %7 = vector.broadcast %cst_5 : f32 to vector<32x256xf32>
    %8 = arith.maximumf %6, %7 : vector<32x256xf32>
    %c0_6 = arith.constant 0 : index
    %c0_7 = arith.constant 0 : index
    %9 = vector.load %arg4[%c0_6, %c0_7] : memref<8x32xf32, #tpu.memory_space<vmem>>, vector<8x32xf32>
    %cst_8 = arith.constant dense<0.000000e+00> : vector<8x256xf32>
    %10 = tpu.matmul %9, %8, %cst_8 {dimension_numbers = #tpu.dot_dimension_numbers<[1], [0], [0], [1], [0, 0, 1, 1], [], []>} : vector<8x32xf32>, vector<32x256xf32>, vector<8x256xf32> -> vector<8x256xf32>
    %c0_9 = arith.constant 0 : index
    %c0_10 = arith.constant 0 : index
    %11 = vector.load %arg5[%c0_9, %c0_10] : memref<8x1xf32, #tpu.memory_space<vmem>>, vector<8x1xf32>
    %12 = vector.broadcast %11 : vector<8x1xf32> to vector<8x256xf32>
    %13 = arith.addf %10, %12 : vector<8x256xf32>
    %c0_11 = arith.constant 0 : index
    %c0_12 = arith.constant 0 : index
    %14 = vector.load %arg6[%c0_11, %c0_12] : memref<8x256xf32, #tpu.memory_space<vmem>>, vector<8x256xf32>
    tpu.vector_store %arg6[%c0_11, %c0_12], %13 {strides = array<i32>} : memref<8x256xf32, #tpu.memory_space<vmem>>, vector<8x256xf32>,
    return
  }
  func.func @transform_0(%arg0: i32) -> (i32, i32) {
    %c0_i32 = arith.constant 0 : i32
    %c0_i32_0 = arith.constant 0 : i32
    return %arg0, %c0_i32 : i32, i32
  }
  func.func @transform_1(%arg0: i32) -> (i32, i32) {
    %c0_i32 = arith.constant 0 : i32
    %c0_i32_0 = arith.constant 0 : i32
    %c0_i32_1 = arith.constant 0 : i32
    return %c0_i32, %c0_i32_0 : i32, i32
  }
  func.func @transform_2(%arg0: i32) -> (i32, i32) {
    %c0_i32 = arith.constant 0 : i32
    %c0_i32_0 = arith.constant 0 : i32
    %c0_i32_1 = arith.constant 0 : i32
    return %c0_i32, %c0_i32_0 : i32, i32
  }
  func.func @transform_3(%arg0: i32) -> (i32, i32) {
    %c0_i32 = arith.constant 0 : i32
    %c0_i32_0 = arith.constant 0 : i32
    %c0_i32_1 = arith.constant 0 : i32
    return %c0_i32, %c0_i32_0 : i32, i32
  }
  func.func @transform_4(%arg0: i32) -> (i32, i32) {
    %c0_i32 = arith.constant 0 : i32
    %c0_i32_0 = arith.constant 0 : i32
    %c0_i32_1 = arith.constant 0 : i32
    return %c0_i32, %c0_i32_0 : i32, i32
  }
  func.func @transform_5(%arg0: i32) -> (i32, i32) {
    %c0_i32 = arith.constant 0 : i32
    %c0_i32_0 = arith.constant 0 : i32
    return %c0_i32, %arg0 : i32, i32
  }
}

</mosaic_0001>

<bundles_post_ra>
// kernel: tpu_custom_call.1
= control target key start
LH: loop header
LB: loop body
LE: loop exit
PB: predicated region body
PF: predicated region fallthrough
CT: control target
= control target key end

     0   :  { %10 = vsyncpa [#allocation3], 0  ;;  %s1038_s0 = inlined_call_operand.vmem [shape: f32[300,16], index: 0, kind: input, shape index: {}]   ;;  %s1039_s1 = inlined_call_operand.vmem [shape: f32[32,16], index: 1, kind: input, shape index: {}]   ;;  %s1040_s2 = inlined_call_operand.vmem [shape: f32[32,1], index: 2, kind: input, shape index: {}]   ;;  %s1041_s3 = inlined_call_operand.vmem [shape: f32[8,32], index: 3, kind: input, shape index: {}]   ;;  %s1042_s4 = inlined_call_operand.vmem [shape: f32[8,1], index: 4, kind: input, shape index: {}]   ;;  %s1043_s5 = inlined_call_operand.hbm [shape: f32[8,300], index: 5, kind: output, shape index: {}]  }
   0x1   :  { %12 = vsyncpa [#allocation3 + $0x1], 0  ;;  %s829_s18 = smov 0   ;;  %s831_s19 = smov 0  }
   0x2   :  { %s833_s20 = smov 0   ;;  %s835_s21 = smov 0  }
   0x3 LB: > { %s850_s22 = sadd.s32 4294967295, %s795_s21   ;;  %s621_s23 = sadd.s32 4294967294, %s795_s21   ;;  %s795_s21 = sphi %s835_s21, %s1050_s21   ;;  %s791_s20 = sphi %s833_s20, %s1049_s20   ;;  %s787_s19 = sphi %s831_s19, %s1048_s19   ;;  %s783_s18 = sphi %s829_s18, %s1047_s18  }
   0x4   : > { %s854_s24 = sadd.s32 1, %s795_s21   ;;  %s135_s25 = sadd.s32 1, %s791_s20 }
   0x5   : > { %s132_s26 = ssub.s32 %s795_s21, %s854_s24  ;;  %p145_p0 = scmp.ne.s32.totalorder %s791_s20, %s787_s19 }
   0x6   : > { %p133_p1 = scmp.eq.s32.totalorder %s132_s26, 0  ;;  %p146_p2 = scmp.eq.s32.totalorder %s850_s22, 1 }
   0x7   : > { %p151_p3 = scmp.ne.s32.totalorder %s787_s19, %s783_s18  ;;  %p152_p4 = scmp.eq.s32.totalorder %s621_s23, 1 }
   0x8   : > { %s865_s27 = scalar_select %p133_p1, %s791_s20, %s135_s25  }
   0x9   : > { %p867_p5 = por %p146_p2, %p145_p0  ;;  %p871_p6 = por %p152_p4, %p151_p3 }
   0xa   : > { %p624_p7 = scmp.ge.s32.totalorder %s795_s21, 1  ;;  %p199_p8 = scmp.lt.s32.totalorder %s795_s21, 3 }
   0xc   : > { %p200_p9 = pnand %p624_p7, %p199_p8 }
   0xd   : > { %s626_s30 = sshll.u32 (!%p200_p9), %s850_s22, 5  ;;  %s228_s14 = sand.u32 (!%p200_p9), 1, %s787_s19  }
   0xe   : > { %203 = sbr.rel (%p200_p9) target bundleno = 413 (0x19d), region = 40  ;;  %p236_p10 = scmp.lt.s32.totalorder (!%p200_p9), %s626_s30, 37 }
   0xf   : > { %s625_s15 = sshll.u32 (!%p200_p9), %s228_s14, 4  ;;  %s986_s17 = scalar_lea.sflag (!%p200_p9), [#allocation3], %s228_s14 }
  0x10   : > { %s230_s16 = scalar_lea.vmem (!%p200_p9), [#allocation2], %s625_s15 }
  0x13   : > { %s1052_s30 = smov (!%p236_p10, %s626_s30), 37  ;;  %vm310_vm0 = vcmask 130048   ;;  %v287_v18 = vld [vmem:[%s1040_s2 + $0x8] sm:$0xff]  ;;  %v797_v21 = vmov 0   ;;  %v286_v24 = vld [vmem:[%s1040_s2] sm:$0xff]  ;;  %v289_v29 = vld [vmem:[%s1040_s2 + $0x18] sm:$0xff] }
  0x14   : > { %s627_s6 = sshll.u32 %s1052_s30, 3  ;;  %720 = vset.pattern.permute.xlu1 %v797_v21  ;;  %719 = vset.pattern.permute.xlu0 %v797_v21  ;;  %v288_v34 = vld [vmem:[%s1040_s2 + $0x10] sm:$0xff]  ;;  %v282_v37 = vld [vmem:[%s1039_s1] sm:$0xff]  ;;  %v283_v38 = vld [vmem:[%s1039_s1 + $0x8] sm:$0xff]  ;;  %vm492_vm1 = vcmask 261120   ;;  %s671_s23 = sshll.u32 (%p867_p5), %s850_s22, 1 }
  0x15   : > { %s881_s9 = scalar_lea.vmem %s1038_s0, %s627_s6  ;;  %297 = vperm.xlu1 %720, %v287_v18   ;;  %721 = vset.pattern.permute.xlu2 %v797_v21  ;;  %v284_v39 = vld [vmem:[%s1039_s1 + $0x10] sm:$0xff]  ;;  %v285_v40 = vld [vmem:[%s1039_s1 + $0x18] sm:$0xff]  ;;  %v486_v43 = vld [vmem:[%s1042_s4] sm:$0xff]  ;;  %s547_s25 = ssub.s32 (%p867_p5), 3, %s671_s23 }
  0x16   : > { %v265_v0 = vld [vmem:[%s881_s9 + $0x78] sm:$0xff]  ;;  %v264_v2 = vld [vmem:[%s881_s9 + $0x70] sm:$0xff]  ;;  %v263_v4 = vld [vmem:[%s881_s9 + $0x68] sm:$0xff]  ;;  %307 = vperm.xlu0 %719, %v289_v29   ;;  %489 = vperm.xlu2 %721, %v486_v43   ;;  %p548_p11 = scmp.lt.s32.totalorder (%p867_p5), %s547_s25, 2 }
  0x17   : > { %v281_v1 = vld [vmem:[%s881_s9 + $0xf8] sm:$0xff]  ;;  %628 = vmatpush.xpose.msk.msra.mxu0 %vm310_vm0, %v265_v0  ;;  %v280_v3 = vld [vmem:[%s881_s9 + $0xf0] sm:$0xff]  ;;  %v279_v5 = vld [vmem:[%s881_s9 + $0xe8] sm:$0xff] }
  0x18   : > { %648 = vmatpush.xpose.msk.msra.mxu1 %vm310_vm0, %v281_v1  ;;  %v262_v6 = vld [vmem:[%s881_s9 + $0x60] sm:$0xff]  ;;  %v261_v8 = vld [vmem:[%s881_s9 + $0x58] sm:$0xff]  ;;  %v260_v10 = vld [vmem:[%s881_s9 + $0x50] sm:$0xff] }
  0x19   : > { %v278_v7 = vld [vmem:[%s881_s9 + $0xe0] sm:$0xff]  ;;  %v277_v9 = vld [vmem:[%s881_s9 + $0xd8] sm:$0xff]  ;;  %v276_v11 = vld [vmem:[%s881_s9 + $0xd0] sm:$0xff] }
  0x1a   : > { %v259_v12 = vld [vmem:[%s881_s9 + $0x48] sm:$0xff]  ;;  %v258_v14 = vld [vmem:[%s881_s9 + $0x40] sm:$0xff]  ;;  %v257_v16 = vld [vmem:[%s881_s9 + $0x38] sm:$0xff] }
  0x1b   : > { %629 = vmatpush.xpose.msk.msra.mxu0 %vm310_vm0, %v264_v2  ;;  %v275_v13 = vld [vmem:[%s881_s9 + $0xc8] sm:$0xff]  ;;  %v274_v15 = vld [vmem:[%s881_s9 + $0xc0] sm:$0xff]  ;;  %v273_v17 = vld [vmem:[%s881_s9 + $0xb8] sm:$0xff] }
  0x1c   : > { %649 = vmatpush.xpose.msk.msra.mxu1 %vm310_vm0, %v280_v3  ;;  %v256_v19 = vld [vmem:[%s881_s9 + $0x30] sm:$0xff]  ;;  %v255_v22 = vld [vmem:[%s881_s9 + $0x28] sm:$0xff]  ;;  %v254_v25 = vld [vmem:[%s881_s9 + $0x20] sm:$0xff] }
  0x1d   : > { %v272_v20 = vld [vmem:[%s881_s9 + $0xb0] sm:$0xff]  ;;  %v271_v23 = vld [vmem:[%s881_s9 + $0xa8] sm:$0xff]  ;;  %v270_v26 = vld [vmem:[%s881_s9 + $0xa0] sm:$0xff]  ;;  %292 = vperm.xlu1 %720, %v286_v24  }
  0x1e   : > { %v253_v27 = vld [vmem:[%s881_s9 + $0x18] sm:$0xff]  ;;  %v252_v30 = vld [vmem:[%s881_s9 + $0x10] sm:$0xff]  ;;  %v251_v32 = vld [vmem:[%s881_s9 + $0x8] sm:$0xff]  ;;  %302 = vperm.xlu0 %719, %v288_v34  }
  0x1f   : > { %630 = vmatpush.xpose.msk.msra.mxu0 %vm310_vm0, %v263_v4  ;;  %v269_v28 = vld [vmem:[%s881_s9 + $0x98] sm:$0xff]  ;;  %v268_v31 = vld [vmem:[%s881_s9 + $0x90] sm:$0xff]  ;;  %v267_v33 = vld [vmem:[%s881_s9 + $0x88] sm:$0xff] }
  0x20   : > { %650 = vmatpush.xpose.msk.msra.mxu1 %vm310_vm0, %v279_v5  ;;  %v250_v35 = vld [vmem:[%s881_s9] sm:$0xff] }
  0x21   : > { %v266_v36 = vld [vmem:[%s881_s9 + $0x80] sm:$0xff] }
  0x23   : > { %631 = vmatpush.xpose.msk.msra.mxu0 %vm310_vm0, %v262_v6  ;;  %v485_v6 = vld [vmem:[%s1041_s3] sm:$0xff] }
  0x24   : > { %651 = vmatpush.xpose.msk.msra.mxu1 %vm310_vm0, %v278_v7 }
  0x27   : > { %632 = vmatpush.xpose.msk.msra.mxu0 %vm310_vm0, %v261_v8 }
  0x28   : > { %652 = vmatpush.xpose.msk.msra.mxu1 %vm310_vm0, %v277_v9 }
  0x2b   : > { %633 = vmatpush.xpose.msk.msra.mxu0 %vm310_vm0, %v260_v10 }
  0x2c   : > { %653 = vmatpush.xpose.msk.msra.mxu1 %vm310_vm0, %v276_v11 }
  0x2f   : > { %634 = vmatpush.xpose.msk.msra.mxu0 %vm310_vm0, %v259_v12 }
  0x30   : > { %654 = vmatpush.xpose.msk.msra.mxu1 %vm310_vm0, %v275_v13 }
  0x33   : > { %635 = vmatpush.xpose.msk.msra.mxu0 %vm310_vm0, %v258_v14 }
  0x34   : > { %655 = vmatpush.xpose.msk.msra.mxu1 %vm310_vm0, %v274_v15 }
  0x37   : > { %636 = vmatpush.xpose.msk.msra.mxu0 %vm310_vm0, %v257_v16 }
  0x38   : > { %656 = vmatpush.xpose.msk.msra.mxu1 %vm310_vm0, %v273_v17 }
  0x3b   : > { %637 = vmatpush.xpose.msk.msra.mxu0 %vm310_vm0, %v256_v19 }
  0x3c   : > { %657 = vmatpush.xpose.msk.msra.mxu1 %vm310_vm0, %v272_v20 }
  0x3f   : > { %638 = vmatpush.xpose.msk.msra.mxu0 %vm310_vm0, %v255_v22 }
  0x40   : > { %658 = vmatpush.xpose.msk.msra.mxu1 %vm310_vm0, %v271_v23 }
  0x43   : > { %639 = vmatpush.xpose.msk.msra.mxu0 %vm310_vm0, %v254_v25 }
  0x44   : > { %659 = vmatpush.xpose.msk.msra.mxu1 %vm310_vm0, %v270_v26 }
  0x47   : > { %640 = vmatpush.xpose.msk.msra.mxu0 %vm310_vm0, %v253_v27 }
  0x48   : > { %660 = vmatpush.xpose.msk.msra.mxu1 %vm310_vm0, %v269_v28 }
  0x4b   : > { %641 = vmatpush.xpose.msk.msra.mxu0 %vm310_vm0, %v252_v30 }
  0x4c   : > { %661 = vmatpush.xpose.msk.msra.mxu1 %vm310_vm0, %v268_v31 }
  0x4f   : > { %642 = vmatpush.xpose.msk.msra.mxu0 %vm310_vm0, %v251_v32 }
  0x50   : > { %662 = vmatpush.xpose.msk.msra.mxu1 %vm310_vm0, %v267_v33 }
  0x53   : > { %643 = vmatpush.xpose.msk.msra.mxu0 %vm310_vm0, %v250_v35 }
  0x54   : > { %663 = vmatpush.xpose.msk.msra.mxu1 %vm310_vm0, %v266_v36 }
  0x56   : > { %644 = vmatmul.msk.f32.vlgmr.msra.gmra.mxu0 %vm310_vm0, %v282_v37 }
  0x57   : > { %664 = vmatmul.msk.f32.vlgmr.msra.gmra.mxu1 %vm310_vm0, %v282_v37 }
  0x5e   : > { %645 = vmatmul.msk.f32.gmra.mxu0 %vm310_vm0, %v283_v38 }
  0x5f   : > { %665 = vmatmul.msk.f32.gmra.mxu1 %vm310_vm0, %v283_v38 }
  0x66   : > { %646 = vmatmul.msk.f32.gmra.mxu0 %vm310_vm0, %v284_v39 }
  0x67   : > { %666 = vmatmul.msk.f32.gmra.mxu1 %vm310_vm0, %v284_v39 }
  0x6e   : > { %647 = vmatmul.msk.f32.gmra.mxu0 %vm310_vm0, %v285_v40 }
  0x6f   : > { %667 = vmatmul.msk.f32.gmra.mxu1 %vm310_vm0, %v285_v40 }
  0x70   : > { %v490_v7 = vpop.permute.xlu2 %489 }
  0x87   : > { %v298_v47 = vpop.permute.xlu1 %297 }
  0x88   : > { %v308_v46 = vpop.permute.xlu0 %307 }
  0x8f   : > { %v293_v57 = vpop.permute.xlu1 %292 }
  0x90   : > { %v303_v50 = vpop.permute.xlu0 %302 }
  0xd3   : > { %v436_v41 = vpop.f32.mrf.mxu0 }
  0xd4   : > { %v465_v42 = vpop.f32.mrf.mxu1  ;;  %v437_v62 = vadd.f32 %v436_v41, %v293_v57 }
  0xd5   : > { %v466_v63 = vadd.f32 %v465_v42, %v293_v57 }
  0xd6   : > { %v477_v4 = vmax.f32 %v437_v62, 0.0 }
  0xd7   : > { %v478_v5 = vmax.f32 %v466_v63, 0.0 }
  0xdb   : > { %v439_v44 = vpop.f32.mrf.mxu0 }
  0xdc   : > { %v468_v45 = vpop.f32.mrf.mxu1  ;;  %v440_v58 = vadd.f32 %v439_v44, %v298_v47 }
  0xdd   : > { %v469_v59 = vadd.f32 %v468_v45, %v298_v47 }
  0xde   : > { %v479_v2 = vmax.f32 %v440_v58, 0.0 }
  0xdf   : > { %v480_v3 = vmax.f32 %v469_v59, 0.0 }
  0xe3   : > { %v442_v48 = vpop.f32.mrf.mxu0 }
  0xe4   : > { %v471_v49 = vpop.f32.mrf.mxu1  ;;  %v443_v53 = vadd.f32 %v442_v48, %v303_v50 }
  0xe5   : > { %v472_v54 = vadd.f32 %v471_v49, %v303_v50 }
  0xe6   : > { %v481_v0 = vmax.f32 %v443_v53, 0.0 }
  0xe7   : > { %v482_v1 = vmax.f32 %v472_v54, 0.0 }
  0xeb   : > { %v445_v51 = vpop.f32.mrf.mxu0 }
  0xec   : > { %v474_v52 = vpop.f32.mrf.mxu1  ;;  %v446_v55 = vadd.f32 %v445_v51, %v308_v46 }
  0xed   : > { %v475_v56 = vadd.f32 %v474_v52, %v308_v46 }
  0xee   : > { %v483_v60 = vmax.f32 %v446_v55, 0.0 }
  0xef   : > { %v484_v61 = vmax.f32 %v475_v56, 0.0 }
  0xf0   : > { %508 = vmatpush.msra.mxu2 %v483_v60 }
  0xf1   : > { %528 = vmatpush.msra.mxu3 %v484_v61 }
  0xf2   : > { %509 = vmatpush.msra.mxu2 %v481_v0 }
  0xf3   : > { %529 = vmatpush.msra.mxu3 %v482_v1 }
  0xf4   : > { %510 = vmatpush.msra.mxu2 %v479_v2 }
  0xf5   : > { %530 = vmatpush.msra.mxu3 %v480_v3 }
  0xf6   : > { %511 = vmatpush.msra.mxu2 %v477_v4 }
  0xf7   : > { %531 = vmatpush.msra.mxu3 %v478_v5  ;;  %668 = vmatmul.msk.f32.vlgmr.msra.gmra.mxu2 %vm492_vm1, %v485_v6 }
  0xf8   : > { %669 = vmatmul.msk.f32.vlgmr.msra.gmra.mxu3 %vm492_vm1, %v485_v6 }
 0x17a   : > { %v513_v8 = vpop.f32.mrf.mxu2  ;;  %545 = sbr.rel (!%p867_p5) target bundleno = 413 (0x19d), region = 44 }
 0x17b   : > { %v533_v9 = vpop.f32.mrf.mxu3  ;;  %v514_v10 = vadd.f32 %v513_v8, %v490_v7 }
 0x17c   : > { %v534_v11 = vadd.f32 %v533_v9, %v490_v7 }
 0x17d   : > { %536 = vst [vmem:[%s230_s16] sm:$0xff] %v514_v10 }
 0x17e   : > { %537 = vst [vmem:[%s230_s16 + $0x8] sm:$0xff] %v534_v11 }
 0x17f   : > { %s1054_s25 = smov (!%p548_p11, %s547_s25), 2 }
 0x180   : > { %s672_s26 = sshll.u32 %s1054_s25, 3 }
 0x181   : > { %s551_s30 = ssub.s32 16, %s672_s26 }
 0x182   : > { %s552_s6 = sshll.u32 %s551_s30, 4 }
 0x183   : > { %553 = vsyncadd %s986_s17, %s552_s6  ;;  %p995_p12 = scmp.ne.s32.totalorder %s672_s26, 0  ;;  %s679_s28 = sshll.u32 %s850_s22, 4 }
 0x184   : > { %s556_s10 = scalar_lea.hbm %s1043_s5, %s679_s28  ;;  %s676_s11 = sshll.u32 %s1054_s25, 7 }
 0x185   : > { %s559_s12 = sshll.u32 %s230_s16, 4  ;;  %s561_s13 = sshll.u32 %s556_s10, 4  ;;  %s560_s12 = int_to_ptr.vmem [resolvable:$true] %s559_s12  ;;  %s562_s13 = int_to_ptr.hbm [resolvable:$true] %s561_s13 }
 0x186   : > { %s722_s14 = sshra.s32 %s560_s12, 4  ;;  %s724_s15 = sshrl.u32 %s676_s11, 4  ;;  %s723_s14 = int_to_ptr.vmem [resolvable:$true] %s722_s14 }
 0x187   : > { %s729_s23 = scalar_lea.vmem %s723_s14, %s724_s15  ;;  %s798_s26 = smov [#allocation2]  }
 0x188   : > { %p730_p13 = scmp.ne.s32.totalorder %s723_s14, %s729_s23  ;;  %s733_s22 = scalar_lea.vmem %s798_s26, 32 }
 0x189   : > { %p735_p2 = scmp.lt.s32.totalorder %s733_s22, %s729_s23 }
 0x18a   : > { %p731_p0 = pnand %p730_p13, %p995_p12 }
 0x18c   : > { %p732_p1 = pneg %p731_p0 }
 0x18e   : > { %p737_p3 = pnand %p735_p2, %p732_p1 }
 0x190   : > { %740 = shalt.err (!%p737_p3)
}
 0x191   : > { %s741_s30 = sshra.s32 %s562_s13, 4  ;;  %s752_s8 = scalar_lea.hbm %s1043_s5, 24  ;;  %s742_s30 = int_to_ptr.hbm [resolvable:$true] %s741_s30 }
 0x192   : > { %s748_s16 = scalar_lea.hbm %s742_s30, %s724_s15  ;;  %p753_p8 = scmp.lt.s32.totalorder %s742_s30, %s1043_s5 }
 0x193   : > { %p749_p4 = scmp.ne.s32.totalorder %s742_s30, %s748_s16  ;;  %p754_p9 = scmp.lt.s32.totalorder %s752_s8, %s748_s16 }
 0x195   : > { %p750_p5 = pnand %p749_p4, %p995_p12  ;;  %p755_p10 = por %p754_p9, %p753_p8 }
 0x197   : > { %p751_p7 = pneg %p750_p5 }
 0x199   : > { %p756_p11 = pnand %p755_p10, %p751_p7 }
 0x19b   : > { %759 = shalt.err (!%p756_p11)
}
 0x19c   : > { %564 = dma.vmem_to_hbm [thread:$0]  (%p995_p12), %s560_s12, %s676_s11, %s562_s13, %s986_s17  }
 0x19d PF: > { %p685_p13 = scmp.ge.s32.totalorder %s795_s21, 2  ;;  %s573_s14 = sand.u32 1, %s783_s18  }
 0x19e   : > { %s574_s15 = scalar_lea.sflag [#allocation3], %s573_s14 }
 0x19f   : > { %p682_p0 = pnand %p685_p13, %p871_p6 }
 0x1a1   : > { %p683_p1 = pneg %p682_p0 }
 0x1a3   : > { %778 = dma.done.wait (%p683_p1), %s574_s15, 256  }
 0x1a4   : > { %780 = vsyncadd (%p683_p1), %s574_s15, 4294967040  ;;  %p15_p2 = scmp.ge.s32.totalorder %s854_s24, 4   ;;  %s1047_s18 = smov %s787_s19 }
 0x1a5   : > { %s1048_s19 = smov %s791_s20  ;;  %s1049_s20 = smov %s865_s27 }
 0x1a6   : > { %s1050_s21 = smov %s854_s24  ;;  %17 = sbr.rel (!%p15_p2) target bundleno = 3 (0x3), region = 75 }
 0x1ab   :  { %580 = vsyncpa [#allocation3], 1 }
 0x1ac   :  { %582 = vsyncpa [#allocation3 + $0x1], 1 }

</bundles_post_ra>
